<compile_context>
chip_gen: v7x
topology: tpu7x:2x2x1
jax: 0.10.0
libtpu: 0.0.40
codegen_flags: <defaults>
</compile_context>

<pallas_src>
import jax
import jax.numpy as jnp
from jax import lax
from jax.experimental import pallas as pl
from jax.experimental.pallas import tpu as pltpu


def _round_up(x: int, m: int) -> int:
    return ((x + m - 1) // m) * m


def _tpu_generation() -> str:
    try:
        kind = jax.devices()[0].device_kind.lower()
    except Exception:
        return "unknown"
    if "v7" in kind:
        return "v7x"
    if "v6" in kind:
        return "v6e"
    if "v5" in kind:
        return "v5e"
    return "unknown"


# (tm_cap, tn_cap, vmem_limit_bytes, per-call VMEM tile budget for fit check)
_GEN_CONFIG = {
    "v7x": (256, 1024, 48 << 20, 36 << 20),   # 64 MiB physical VMEM
    "v6e": (256, 2048, 96 << 20, 72 << 20),   # 128 MiB physical VMEM
    "v5e": (256, 1024, 64 << 20, 48 << 20),   # 128 MiB physical, low HBM BW
    "unknown": (256, 1024, 64 << 20, 48 << 20),
}


def _choose_tiles(M: int, Kp: int, Np: int, gen: str):
    tm_cap, tn_cap, _, budget = _GEN_CONFIG[gen]
    tm = min(tm_cap, _round_up(max(M, 1), 16))       # bf16 sublane packing

    def fits(tn):
        per_buf = tm * Kp * 2 + Kp * tn * 2 + tm * tn * 4 + tn * 4
        return 2 * per_buf <= budget                  # double-buffered

    # Candidate tn: multiples of 128 that divide Np, descending (128 always works).
    cands = [t for t in range(Np, 127, -128) if Np % t == 0]
    tn = 128
    for t in cands:
        if t <= tn_cap and fits(t):
            tn = t
            break

    # v7x has 2 TensorCores: make sure a 'parallel' axis has >= 2 blocks.
    Mp = _round_up(M, tm)
    if gen == "v7x" and Mp // tm == 1 and Np // tn == 1:
        for t in cands:
            if Np // t >= 2 and fits(t):
                tn = t
                break
    return tm, tn


# ---------------------------------------------------------------------------
# Fused Pallas kernel (full-K, no reduction grid axis):
#   o = tanh( (x @ W) * rsqrt(sum(x^2, -1)) + b )
#   x_ref: (tm, Kp) bf16   w_ref: (Kp, tn) bf16   b_ref: (1, tn) f32
#   o_ref: (tm, tn) f32
# Grid = (M tiles, N tiles); j is innermost so the x block (index (i, 0)) stays
# resident across the N sweep.
# ---------------------------------------------------------------------------
def _encoder_head_kernel(x_ref, w_ref, b_ref, o_ref):
    x = x_ref[...]                                                  # (tm, Kp) bf16
    dot = jnp.dot(x, w_ref[...], preferred_element_type=jnp.float32)   # MXU
    xf = x.astype(jnp.float32)
    ss = jnp.sum(xf * xf, axis=1, keepdims=True)                    # (tm, 1) VPU/XLU
    inv_norm = lax.rsqrt(jnp.maximum(ss, 1e-12))                    # EUP
    o_ref[...] = jnp.tanh(dot * inv_norm + b_ref[...]).astype(o_ref.dtype)


def prepare_head_params(fc_w, fc_b):
    """One-time weight prep (hoisted out of the forward pass):
    pad fc weights/bias to lane-aligned shapes and cast W to bf16."""
    K, N = fc_w.shape
    Kp, Np = _round_up(K, 128), _round_up(N, 128)
    wb = jnp.zeros((Kp, Np), jnp.bfloat16).at[:K, :N].set(fc_w.astype(jnp.bfloat16))
    bb = jnp.zeros((1, Np), jnp.float32).at[0, :N].set(fc_b.astype(jnp.float32))
    return wb, bb


def encoder_head(x, wb, bb, out_dim):
    """tanh( l2_normalize(x, -1) @ W + b ) via one fused Pallas kernel.

    x:  [M, K] f32 (un-normalized embeddings)
    wb: [Kp, Np] bf16 (pre-padded / pre-cast, Kp >= K), bb: [1, Np] f32
    Normalization folded algebraically: (x/||x||) @ W == (x @ W) * rsqrt(sum(x^2)).
    NOTE: full-K design assumes model_dim fits a single block (K <= ~4096),
    which holds for every OpenAI embedding size (<= 3072).
    """
    M, K = x.shape
    Kp, Np = wb.shape
    assert K <= Kp

    gen = _tpu_generation()
    tm, tn = _choose_tiles(M, Kp, Np, gen)
    Mp = _round_up(M, tm)

    # Only materialize a padded copy of x when actually ragged.
    if M == Mp and K == Kp:
        xb = x.astype(jnp.bfloat16)
    else:
        xb = jnp.zeros((Mp, Kp), jnp.bfloat16).at[:M, :K].set(x.astype(jnp.bfloat16))

    grid = (Mp // tm, Np // tn)

    cost = pl.CostEstimate(
        flops=2 * Mp * Kp * Np + 3 * Mp * Kp,
        transcendentals=Mp * Np + Mp * grid[1],
        bytes_accessed=(Mp * Kp * 2)                       # x streamed once (j inner)
        + grid[0] * (Kp * Np * 2 + Np * 4)                 # W + bias per i tile
        + (Mp * Np * 4),                                   # output writeback
    )

    _, _, vmem_limit, _ = _GEN_CONFIG[gen]

    out = pl.pallas_call(
        _encoder_head_kernel,
        out_shape=jax.ShapeDtypeStruct((Mp, Np), jnp.float32),
        grid_spec=pltpu.PrefetchScalarGridSpec(
            num_scalar_prefetch=0,
            grid=grid,
            in_specs=[
                pl.BlockSpec((tm, Kp), lambda i, j: (i, 0)),
                pl.BlockSpec((Kp, tn), lambda i, j: (0, j)),
                pl.BlockSpec((1, tn), lambda i, j: (0, j)),
            ],
            out_specs=pl.BlockSpec((tm, tn), lambda i, j: (i, j)),
        ),
        compiler_params=pltpu.CompilerParams(
            dimension_semantics=("parallel", "parallel"),
            vmem_limit_bytes=vmem_limit,
        ),
        cost_estimate=cost,
    )(xb, wb, bb)

    return out[:M, :out_dim]


# ---------------------------------------------------------------------------
# Deterministic stand-in for the OpenAI embeddings API.
# TODO(synk): self.client.embeddings.create(...) is a remote HTTP call with no
# Pallas equivalent; replaced by a deterministic masked-mean token-embedding
# lookup (padding id 0 dropped; all-padding sequence -> embedding of token 0).
# The L2 normalization of the API output is fused into the Pallas kernel.
# ---------------------------------------------------------------------------
def fake_openai_embed(input_ids, attention_mask, embed_table):
    del attention_mask  # reference forward never uses it
    tok_emb = embed_table[input_ids]                          # [B, Ns, L, D]
    mask = (input_ids != 0).astype(jnp.float32)[..., None]    # [B, Ns, L, 1]
    summed = jnp.sum(tok_emb * mask, axis=2)                  # [B, Ns, D]
    count = jnp.sum(mask, axis=2)                             # [B, Ns, 1]
    mean = summed / jnp.maximum(count, 1.0)
    fallback = jnp.broadcast_to(embed_table[0], mean.shape)   # empty -> token 0
    emb = jnp.where(count == 0.0, fallback, mean)
    return emb.astype(jnp.float32)                            # NOT yet L2-normalized


# ---------------------------------------------------------------------------
# TextEncoderOpenAI.forward (add_fc_layer=True path)
# ---------------------------------------------------------------------------
@jax.jit
def text_encoder_openai_forward(input_ids, attention_mask, params):
    emb = fake_openai_embed(input_ids, attention_mask, params["embed_table"])
    B, N_seq, D_in = emb.shape
    out_dim = params["fc_w"].shape[1]
    x = emb.reshape(B * N_seq, D_in)
    y = encoder_head(x, params["fc_wb"], params["fc_bb"], out_dim)
    return y.reshape(B, N_seq, out_dim)


def init_params(key, vocab_size, model_dim, output_dim):
    k1, k2, k3 = jax.random.split(key, 3)
    bound = 1.0 / (model_dim ** 0.5)      # nn.Linear default init
    # stored as [in, out] (pre-transposed vs. PyTorch's [out, in])
    fc_w = jax.random.uniform(k1, (model_dim, output_dim), jnp.float32, -bound, bound)
    fc_b = jax.random.uniform(k2, (output_dim,), jnp.float32, -bound, bound)
    embed_table = jax.random.normal(k3, (vocab_size, model_dim), jnp.float32)
    # Hoisted, one-time weight prep (pad + bf16 cast) -- NOT done per forward.
    fc_wb, fc_bb = prepare_head_params(fc_w, fc_b)
    return {"fc_w": fc_w, "fc_b": fc_b, "embed_table": embed_table,
            "fc_wb": fc_wb, "fc_bb": fc_bb}


if __name__ == "__main__":
    key = jax.random.PRNGKey(0)
    B, N_seq, L = 2, 8, 16
    model_dim, output_dim = 32, 32
    vocab_size = 64

    kp, ki = jax.random.split(key)
    params = init_params(kp, vocab_size, model_dim, output_dim)

    input_ids = jax.random.randint(ki, (B, N_seq, L), 0, vocab_size, dtype=jnp.int32)
    # make one sequence fully padded to exercise the empty-sequence path
    input_ids = input_ids.at[0, 0, :].set(0)
    attention_mask = (input_ids != 0).astype(jnp.int32)

    out = text_encoder_openai_forward(input_ids, attention_mask, params)
    out = jax.block_until_ready(out)
    assert out.shape == (B, N_seq, output_dim)

    # Reference 1: same mixed precision as the kernel (bf16 operands, f32 math).
    emb = fake_openai_embed(input_ids, attention_mask, params["embed_table"])
    xbf = emb.reshape(-1, model_dim).astype(jnp.bfloat16)
    wbf = params["fc_w"].astype(jnp.bfloat16)
    dot = jnp.dot(xbf, wbf, preferred_element_type=jnp.float32)
    ss = jnp.sum(xbf.astype(jnp.float32) ** 2, axis=-1, keepdims=True)
    ref_mixed = jnp.tanh(dot * lax.rsqrt(jnp.maximum(ss, 1e-12)) + params["fc_b"])
    ref_mixed = ref_mixed.reshape(B, N_seq, output_dim)
    assert jnp.allclose(out, ref_mixed, atol=1e-4), "kernel mismatch vs mixed-precision ref"

    # Reference 2: full-f32 semantic check (looser tol due to bf16 operands).
    emb_n = emb / jnp.maximum(jnp.linalg.norm(emb, axis=-1, keepdims=True), 1e-6)
    ref_f32 = jnp.tanh(emb_n @ params["fc_w"] + params["fc_b"])
    assert jnp.allclose(out, ref_f32, atol=2e-2), "kernel mismatch vs f32 ref"

    print("KERNEL_OK")
</pallas_src>

<mosaic_0001>
module attributes {stable_mosaic.version = 11 : i64} {
  func.func @_encoder_head_kernel(%arg0: i32, %arg1: i32, %arg2: memref<16x128xbf16, #tpu.memory_space<vmem>>, %arg3: memref<128x128xbf16, #tpu.memory_space<vmem>>, %arg4: memref<1x128xf32, #tpu.memory_space<vmem>>, %arg5: memref<16x128xf32, #tpu.memory_space<vmem>>) attributes {dimension_semantics = [#tpu.dimension_semantics<parallel>, #tpu.dimension_semantics<parallel>], iteration_bounds = array<i64: 1, 1>, scalar_prefetch = 0 : i64, scratch_operands = 0 : i64, tpu.core_type = #tpu.core_type<tc>, window_params = [{transform_indices = @transform_0, window_bounds = array<i64: 16, 128>}, {transform_indices = @transform_1, window_bounds = array<i64: 128, 128>}, {transform_indices = @transform_2, window_bounds = array<i64: 1, 128>}, {transform_indices = @transform_3, window_bounds = array<i64: 16, 128>}]} {
    %c0 = arith.constant 0 : index
    %c0_0 = arith.constant 0 : index
    %0 = vector.load %arg2[%c0, %c0_0] : memref<16x128xbf16, #tpu.memory_space<vmem>>, vector<16x128xbf16>
    %c0_1 = arith.constant 0 : index
    %c0_2 = arith.constant 0 : index
    %1 = vector.load %arg3[%c0_1, %c0_2] : memref<128x128xbf16, #tpu.memory_space<vmem>>, vector<128x128xbf16>
    %cst = arith.constant dense<0.000000e+00> : vector<16x128xf32>
    %2 = tpu.matmul %0, %1, %cst {dimension_numbers = #tpu.dot_dimension_numbers<[1], [0], [0], [1], [0, 0, 1, 1], [], []>} : vector<16x128xbf16>, vector<128x128xbf16>, vector<16x128xf32> -> vector<16x128xf32>
    %3 = arith.extf %0 : vector<16x128xbf16> to vector<16x128xf32>
    %4 = arith.mulf %3, %3 : vector<16x128xf32>
    %cst_3 = arith.constant dense<0.000000e+00> : vector<16xf32>
    %5 = vector.multi_reduction <add>, %4, %cst_3 [1] : vector<16x128xf32> to vector<16xf32>
    %6 = vector.shape_cast %5 : vector<16xf32> to vector<16x1xf32>
    %cst_4 = arith.constant 9.99999996E-13 : f32
    %7 = vector.broadcast %cst_4 : f32 to vector<16x1xf32>
    %8 = arith.maximumf %6, %7 : vector<16x1xf32>
    %9 = math.rsqrt %8 : vector<16x1xf32>
    %10 = vector.broadcast %9 : vector<16x1xf32> to vector<16x128xf32>
    %11 = arith.mulf %2, %10 : vector<16x128xf32>
    %c0_5 = arith.constant 0 : index
    %c0_6 = arith.constant 0 : index
    %12 = vector.load %arg4[%c0_5, %c0_6] : memref<1x128xf32, #tpu.memory_space<vmem>>, vector<1x128xf32>
    %13 = vector.broadcast %12 : vector<1x128xf32> to vector<16x128xf32>
    %14 = arith.addf %11, %13 : vector<16x128xf32>
    %15 = math.tanh %14 : vector<16x128xf32>
    %c0_7 = arith.constant 0 : index
    %c0_8 = arith.constant 0 : index
    %16 = vector.load %arg5[%c0_7, %c0_8] : memref<16x128xf32, #tpu.memory_space<vmem>>, vector<16x128xf32>
    tpu.vector_store %arg5[%c0_7, %c0_8], %15 {strides = array<i32>} : memref<16x128xf32, #tpu.memory_space<vmem>>, vector<16x128xf32>,
    return
  }
  func.func @transform_0(%arg0: i32, %arg1: i32) -> (i32, i32) {
    %c0_i32 = arith.constant 0 : i32
    %c0_i32_0 = arith.constant 0 : i32
    return %arg0, %c0_i32 : i32, i32
  }
  func.func @transform_1(%arg0: i32, %arg1: i32) -> (i32, i32) {
    %c0_i32 = arith.constant 0 : i32
    %c0_i32_0 = arith.constant 0 : i32
    return %c0_i32, %arg1 : i32, i32
  }
  func.func @transform_2(%arg0: i32, %arg1: i32) -> (i32, i32) {
    %c0_i32 = arith.constant 0 : i32
    %c0_i32_0 = arith.constant 0 : i32
    return %c0_i32, %arg1 : i32, i32
  }
  func.func @transform_3(%arg0: i32, %arg1: i32) -> (i32, i32) {
    %c0_i32 = arith.constant 0 : i32
    return %arg0, %arg1 : i32, i32
  }
}

</mosaic_0001>

<bundles_post_ra>
// kernel: text_encoder_openai_forward.1
= control target key start
LH: loop header
LB: loop body
LE: loop exit
PB: predicated region body
PF: predicated region fallthrough
CT: control target
= control target key end

     0   :  { %8 = vsyncpa [#allocation3], 0  ;;  %s459_s0 = inlined_call_operand.hbm [shape: bf16[16,128], index: 0, kind: input, shape index: {}]   ;;  %s460_s1 = inlined_call_operand.hbm [shape: bf16[128,128], index: 1, kind: input, shape index: {}]   ;;  %s461_s2 = inlined_call_operand.hbm [shape: f32[1,128], index: 2, kind: input, shape index: {}]   ;;  %s462_s3 = inlined_call_operand.hbm [shape: f32[16,128], index: 3, kind: output, shape index: {}]  }
   0x1   :  { %9 = vsyncpa [#allocation6], 0 }
   0x2   :  { %10 = vsyncpa [#allocation4], 0  ;;  %s374_s12 = smov [#allocation5]   ;;  %s375_s14 = smov [#allocation2]  }
   0x3   :  { %s28_s13 = sshll.u32 %s374_s12, 4  ;;  %s16_s15 = sshll.u32 %s375_s14, 4  ;;  %s29_s13 = int_to_ptr.vmem [resolvable:$true] %s28_s13  ;;  %s404_s15 = int_to_ptr.vmem [resolvable:$true] %s16_s15 }
   0x4   :  { %s280_s18 = scalar_lea.hbm %s460_s1, 1024 }
   0x5   :  { %p281_p0 = scmp.ne.s32.totalorder %s460_s1, %s280_s18  ;;  %p284_p1 = scmp.lt.u32.totalorder %s280_s18, %s460_s1 }
   0x7   :  { %p286_p2 = pnand %p284_p1, %p281_p0 }
   0x9   :  { %289 = shalt.err (!%p286_p2)
}
   0xa   :  { %s290_s23 = scalar_lea.vmem %s29_s13, 1024  ;;  %p295_p4 = scmp.lt.s32.totalorder %s29_s13, %s29_s13 }
   0xb   :  { %p291_p3 = scmp.ne.s32.totalorder %s29_s13, %s290_s23  ;;  %p296_p5 = scmp.lt.s32.totalorder %s290_s23, %s290_s23 }
   0xd   :  { %p297_p6 = por %p296_p5, %p295_p4 }
   0xf   :  { %p298_p7 = pnand %p297_p6, %p291_p3 }
  0x11   :  { %301 = shalt.err (!%p298_p7)
}
  0x12   :  { %s376_s24 = smov 64   ;;  %s377_s25 = smov 4  }
  0x13   :  { %34 = dma.hbm_to_vmem [thread:$0]  %s460_s1, 1024, %s29_s13, [#allocation6], %s376_s24, %s376_s24, %s377_s25  }
  0x14   :  { %s302_s30 = scalar_lea.hbm %s459_s0, 128 }
  0x15   :  { %p303_p8 = scmp.ne.s32.totalorder %s459_s0, %s302_s30  ;;  %p306_p9 = scmp.lt.u32.totalorder %s302_s30, %s459_s0 }
  0x17   :  { %p308_p10 = pnand %p306_p9, %p303_p8 }
  0x19   :  { %311 = shalt.err (!%p308_p10)
}
  0x1a   :  { %s312_s8 = scalar_lea.vmem %s404_s15, 128  ;;  %p317_p12 = scmp.lt.s32.totalorder %s404_s15, %s404_s15 }
  0x1b   :  { %p313_p11 = scmp.ne.s32.totalorder %s404_s15, %s312_s8  ;;  %p318_p13 = scmp.lt.s32.totalorder %s312_s8, %s312_s8 }
  0x1d   :  { %p319_p0 = por %p318_p13, %p317_p12 }
  0x1f   :  { %p320_p1 = pnand %p319_p0, %p313_p11 }
  0x21   :  { %323 = shalt.err (!%p320_p1)
}
  0x22   :  { %22 = dma.hbm_to_vmem [thread:$0]  %s459_s0, 128, %s404_s15, [#allocation3], %s376_s24, %s376_s24, %s377_s25  }
  0x23   :  { %s378_s10 = smov [#allocation7]   ;;  %s324_s14 = scalar_lea.hbm %s461_s2, 16 }
  0x24   :  { %s41_s11 = sshll.u32 %s378_s10, 4  ;;  %p325_p2 = scmp.ne.s32.totalorder %s461_s2, %s324_s14  ;;  %s42_s11 = int_to_ptr.vmem [resolvable:$true] %s41_s11 }
  0x25   :  { %p328_p3 = scmp.lt.u32.totalorder %s324_s14, %s461_s2 }
  0x27   :  { %p330_p4 = pnand %p328_p3, %p325_p2 }
  0x29   :  { %333 = shalt.err (!%p330_p4)
}
  0x2a   :  { %s334_s20 = scalar_lea.vmem %s42_s11, 16  ;;  %s338_s0 = scalar_lea.vmem %s42_s11, 32 }
  0x2b   :  { %p335_p5 = scmp.ne.s32.totalorder %s42_s11, %s334_s20  ;;  %p339_p6 = scmp.lt.s32.totalorder %s42_s11, %s42_s11 }
  0x2c   :  { %p340_p7 = scmp.lt.s32.totalorder %s338_s0, %s334_s20 }
  0x2e   :  { %p341_p8 = por %p340_p7, %p339_p6 }
  0x30   :  { %p342_p9 = pnand %p341_p8, %p335_p5 }
  0x32   :  { %345 = shalt.err (!%p342_p9)
}
  0x33   :  { %44 = dma.hbm_to_vmem [thread:$0]  %s461_s2, 16, %s42_s11, [#allocation6]  }
  0x34   :  { %368 = dma.done.wait [#allocation3], 128  }
  0x35   :  { %369 = vsyncadd [#allocation3], 4294967168 }
  0x36   :  { %370 = dma.done.wait [#allocation6], 1040  }
  0x37   :  { %371 = vsyncadd [#allocation6], 4294966256  ;;  %v379_v0 = vmov 0.0   ;;  %vm380_vm0 = vmmov 0   ;;  %v262_v1 = vld [vmem:[#allocation5] sm:$0xff]   ;;  %v263_v2 = vld [vmem:[#allocation5 + $0x8] sm:$0xff]  }
  0x38   :  { %232 = vmatprep.subr.bf16.mxu0 %v379_v0  ;;  %248 = vmatprep.mubr.msk.bf16.mxu0 %vm380_vm0, %v379_v0  ;;  %v264_v3 = vld [vmem:[#allocation5 + $0x10] sm:$0xff]   ;;  %v55_v4 = vld [vmem:[#allocation2] sm:$0xff]   ;;  %v266_v10 = vld [vmem:[#allocation5 + $0x20] sm:$0xff]   ;;  %s381_s2 = smov [#allocation8]  }
  0x39   :  { %233 = vmatpush3.bf16.msra.mxu0 %v262_v1  ;;  %v168_v5 = vunpack.c.l.bf16 %v55_v4  ;;  %v169_v6 = vunpack.c.h.bf16 %v55_v4  ;;  %v265_v7 = vld [vmem:[#allocation5 + $0x18] sm:$0xff]   ;;  %v267_v11 = vld [vmem:[#allocation5 + $0x28] sm:$0xff]   ;;  %v268_v12 = vld [vmem:[#allocation5 + $0x30] sm:$0xff]   ;;  %s200_s22 = sshll.u32 %s381_s2, 4  ;;  %s201_s22 = int_to_ptr.vmem [resolvable:$true] %s200_s22 }
  0x3a   :  { %234 = vmatprep.subr.bf16.mxu0 %v379_v0  ;;  %v269_v13 = vld [vmem:[#allocation5 + $0x38] sm:$0xff]   ;;  %v222_v21 = vld [vmem:[#allocation7] ss:$0 sm:$0xff]  ;;  %s346_s23 = scalar_lea.vmem %s201_s22, 256  ;;  %p351_p11 = scmp.lt.s32.totalorder %s201_s22, %s201_s22 }
  0x3b   :  { %v170_v8 = vmul.f32 %v168_v5, %v168_v5  ;;  %v171_v9 = vmul.f32 %v169_v6, %v169_v6  ;;  %p347_p10 = scmp.ne.s32.totalorder %s201_s22, %s346_s23  ;;  %p352_p12 = scmp.lt.s32.totalorder %s346_s23, %s346_s23 }
  0x3d   :  { %235 = vmatpush3.bf16.msra.mxu0 %v263_v2  ;;  %172 = vadd.xlane.f32.xlu0 %v170_v8  ;;  %p353_p13 = por %p352_p12, %p351_p11 }
  0x3e   :  { %236 = vmatprep.subr.bf16.mxu0 %v379_v0 }
  0x3f   :  { %p354_p0 = pnand %p353_p13, %p347_p10 }
  0x41   :  { %237 = vmatpush3.bf16.msra.mxu0 %v264_v3  ;;  %174 = vadd.xlane.f32.xlu0 %v171_v9 }
  0x42   :  { %238 = vmatprep.subr.bf16.mxu0 %v379_v0 }
  0x45   :  { %239 = vmatpush3.bf16.msra.mxu0 %v265_v7 }
  0x46   :  { %240 = vmatprep.subr.bf16.mxu0 %v379_v0 }
  0x49   :  { %241 = vmatpush3.bf16.msra.mxu0 %v266_v10 }
  0x4a   :  { %242 = vmatprep.subr.bf16.mxu0 %v379_v0 }
  0x4d   :  { %243 = vmatpush3.bf16.msra.mxu0 %v267_v11 }
  0x4e   :  { %244 = vmatprep.subr.bf16.mxu0 %v379_v0 }
  0x51   :  { %245 = vmatpush3.bf16.msra.mxu0 %v268_v12 }
  0x52   :  { %246 = vmatprep.subr.bf16.mxu0 %v379_v0 }
  0x55   :  { %247 = vmatpush3.bf16.msra.mxu0 %v269_v13 }
  0x58   :  { %249 = vmatmul.mubr.bf16.vlgmr.msra.gmra.mrb[0].mxu0 %v55_v4 }
  0xca   :  { %v173_v14 = vpop.xlane.xlu0 %172 }
  0xcb   :  { %v176_v16 = vmax.f32 %v173_v14, 1e-12 }
  0xcd   :  { %272 = vrsqrt.f32 %v176_v16 }
  0xce   :  { %v175_v15 = vpop.xlane.xlu0 %174 }
  0xcf   :  { %v177_v17 = vmax.f32 %v175_v15, 1e-12 }
  0xd1   :  { %274 = vrsqrt.f32 %v177_v17 }
  0xd7   :  { %v273_v18 = vpop.eup %272 }
  0xdb   :  { %v275_v19 = vpop.eup %274 }
 0x12b   :  { %v161_v20 = vpop.f32.mrb[0].mxu0 }
 0x12c   :  { %v180_v22 = vmul.f32 %v273_v18, %v161_v20  ;;  %v250_v23 = vpop.f32.mrb[1].mxu0 }
 0x12d   :  { %v164_v24 = vpop.f32.mrb[2].mxu0 }
 0x12e   :  { %v189_v25 = vadd.f32 %v222_v21, %v180_v22  ;;  %v181_v26 = vmul.f32 %v275_v19, %v164_v24  ;;  %v251_v27 = vpop.f32.mrb[3].mxu0 }
 0x130   :  { %276 = vtanh.f32 %v189_v25  ;;  %v190_v28 = vadd.f32 %v222_v21, %v181_v26 }
 0x132   :  { %278 = vtanh.f32 %v190_v28 }
 0x13a   :  { %v277_v29 = vpop.eup %276 }
 0x13b   :  { %193 = vst [vmem:[#allocation8] sm:$0xff] %v277_v29 }
 0x13c   :  { %v279_v30 = vpop.eup %278 }
 0x13d   :  { %194 = vst [vmem:[#allocation8 + $0x8] sm:$0xff] %v279_v30 }
 0x13e   :  { %357 = shalt.err (!%p354_p0)
}
 0x13f   :  { %s358_s26 = scalar_lea.hbm %s462_s3, 256 }
 0x140   :  { %p359_p1 = scmp.ne.s32.totalorder %s462_s3, %s358_s26  ;;  %p362_p2 = scmp.lt.u32.totalorder %s358_s26, %s462_s3 }
 0x142   :  { %p364_p3 = pnand %p362_p2, %p359_p1 }
 0x144   :  { %367 = shalt.err (!%p364_p3)
}
 0x145   :  { %s382_s4 = smov 128   ;;  %s383_s5 = smov 8  }
 0x146   :  { %206 = dma.vmem_to_hbm [thread:$0]  %s201_s22, 256, %s462_s3, [#allocation4], %s382_s4, %s382_s4, %s383_s5  }
 0x147   :  { %372 = dma.done.wait [#allocation4], 256  }
 0x148   :  { %373 = vsyncadd [#allocation4], 4294967040 }
 0x149   :  { %210 = vsyncpa [#allocation3], 1 }
 0x14a   :  { %211 = vsyncpa [#allocation6], 1 }
 0x14b   :  { %212 = vsyncpa [#allocation4], 1 }

</bundles_post_ra>
